<compile_context>
chip_gen: v5e
topology: v5e:2x2
jax: 0.10.0
libtpu: 0.0.40
codegen_flags: <defaults>
</compile_context>

<pallas_src>
import math

import jax
import jax.numpy as jnp
from jax.experimental import pallas as pl
from jax.experimental.pallas import tpu as pltpu


DEFAULT_TM = 1024
DEFAULT_TN = 1024
DEFAULT_TK = 512


def _round_up(x, m):
    return -(-x // m) * m


def _pick_dividing_tile(dim, desired, align):
    """Largest multiple of `align` <= desired that divides `dim`
    (`dim` must itself be a multiple of `align`)."""
    t = max(align, (min(desired, dim) // align) * align)
    while dim % t:
        t -= align
    return t


def _plan_dim(size, desired, align):
    """Pick (tile, padded_size) for one dimension.

    The dim is always padded to a multiple of `align` (mandatory layout
    padding).  On top of that we either pad up to a multiple of the desired
    tile (cheap when waste is small) or shrink the tile to a clean divisor
    (when the extra padding would waste > ~12.5% of the traffic)."""
    aligned = _round_up(size, align)
    tile = max(align, (min(desired, aligned) // align) * align)
    padded = _round_up(aligned, tile)
    if (padded - aligned) * 8 > padded:
        tile = _pick_dividing_tile(aligned, desired, align)
        padded = aligned
    return tile, padded


# --------------------------------------------------------------------------
# Kernels
# --------------------------------------------------------------------------
def _embedout_kernel_multi_k(x_ref, w_ref, b_ref, o_ref, acc_ref):
    # x_ref: (tm, tk)   bf16 activations tile
    # w_ref: (tk, tn)   bf16 weight tile, already transposed to (hidden, vocab)
    # b_ref: (1, tn)    f32 bias tile
    # o_ref: (tm, tn)   output tile (resident across the k axis)
    # acc_ref: (tm, tn) f32 accumulator scratch
    k = pl.program_id(2)

    @pl.when(k == 0)
    def _init():
        # Fold the bias into the accumulator init: saves the separate zero
        # fill and the (tm, tn) VPU add in the epilogue.
        acc_ref[...] = jnp.broadcast_to(
            b_ref[...].astype(jnp.float32), acc_ref.shape
        )

    acc_ref[...] += jnp.dot(
        x_ref[...], w_ref[...], preferred_element_type=jnp.float32
    )

    @pl.when(k == pl.num_programs(2) - 1)
    def _finalize():
        o_ref[...] = acc_ref[...].astype(o_ref.dtype)


def _embedout_kernel_single_k(x_ref, w_ref, b_ref, o_ref):
    # Single K block: no accumulator scratch, no init/finalize gating.
    acc = jnp.dot(x_ref[...], w_ref[...], preferred_element_type=jnp.float32)
    o_ref[...] = (acc + b_ref[...].astype(jnp.float32)).astype(o_ref.dtype)


# --------------------------------------------------------------------------
# One-time (init-time) parameter preparation
# --------------------------------------------------------------------------
def prepare_embedout_params(
    weight,
    bias,
    *,
    tn=DEFAULT_TN,
    tk=DEFAULT_TK,
    stream_dtype=jnp.bfloat16,
):
    """Prepare nn.Linear parameters once:
       * transpose the weight to (hidden, vocab) -> canonical (tk, tn) RHS,
       * zero-pad hidden/vocab to the tile plan,
       * cast to the streaming dtype (bf16) once, not per call.
    Returns (w_t_padded, bias_padded, plan)."""
    vocab, hidden = weight.shape
    assert bias.shape == (vocab,)

    tk, k_pad = _plan_dim(hidden, tk, 128)
    tn, n_pad = _plan_dim(vocab, tn, 128)

    # v7x megacore: prefer >= 2 blocks along the vocab ("parallel") axis so
    # both TensorCores get work even when the M axis has only one block.
    if n_pad // tn < 2 and tn >= 256:
        tn = _pick_dividing_tile(n_pad, tn // 2, 128)

    w_t = jnp.zeros((k_pad, n_pad), dtype=stream_dtype)
    w_t = w_t.at[:hidden, :vocab].set(weight.T.astype(stream_dtype))
    b_pad = jnp.zeros((1, n_pad), dtype=jnp.float32)
    b_pad = b_pad.at[:, :vocab].set(bias.astype(jnp.float32))

    plan = dict(
        hidden=hidden,
        vocab=vocab,
        k_pad=k_pad,
        n_pad=n_pad,
        tk=tk,
        tn=tn,
        stream_dtype=stream_dtype,
    )
    return w_t, b_pad, plan


# --------------------------------------------------------------------------
# Forward call
# --------------------------------------------------------------------------
def embedout(x, w_t, b_pad, plan, *, tm=DEFAULT_TM, out_dtype=jnp.bfloat16):
    """y = x @ W.T + b (PyTorch nn.Linear) using prepared (transposed, padded,
    bf16) parameters."""
    *lead, hidden = x.shape
    assert hidden == plan["hidden"]
    vocab = plan["vocab"]
    k_pad, n_pad = plan["k_pad"], plan["n_pad"]
    tk, tn = plan["tk"], plan["tn"]
    stream_dtype = plan["stream_dtype"]

    m = math.prod(lead) if lead else 1
    tm, m_pad = _plan_dim(m, tm, 8)

    # Cast once in the wrapper: the kernel re-reads x (n_pad // tn) times, so
    # streaming it in bf16 halves that (repeated) HBM traffic.
    x2 = x.reshape(m, hidden).astype(stream_dtype)
    if (m_pad, k_pad) != (m, hidden):
        x2 = jnp.pad(x2, ((0, m_pad - m), (0, k_pad - hidden)))

    grid_i = m_pad // tm
    grid_j = n_pad // tn
    grid_k = k_pad // tk  # == 1 iff tk == k_pad

    # VMEM budget: double-buffered tiles + accumulator, 2x headroom + a few
    # MiB for Mosaic internal scratch, capped safely below physical VMEM
    # (v7x: 64 MiB per TensorCore).
    def _nbytes(shape, dtype):
        return math.prod(shape) * jnp.dtype(dtype).itemsize

    tile_bytes = (
        _nbytes((tm, tk), x2.dtype)
        + _nbytes((tk, tn), w_t.dtype)
        + _nbytes((1, tn), b_pad.dtype)
        + _nbytes((tm, tn), out_dtype)
    )
    acc_bytes = _nbytes((tm, tn), jnp.float32) if grid_k > 1 else 0
    try:
        vmem_cap = int(pltpu.get_tpu_info().vmem_capacity_bytes)
    except Exception:
        vmem_cap = 64 << 20  # conservative: v7x per-core VMEM
    cap_bytes = min((vmem_cap * 3) // 4, 56 << 20)
    vmem_limit = min(
        max(2 * (2 * tile_bytes + acc_bytes), 16 << 20) + (4 << 20), cap_bytes
    )

    out_shape = jax.ShapeDtypeStruct((m_pad, n_pad), out_dtype)

    # NOTE(v5e): if profiling shows the weight DMA still exposed after the
    # bf16 switch, bump the weight BlockSpec to pipeline_mode=pl.Buffered(3).
    if grid_k == 1:
        out = pl.pallas_call(
            _embedout_kernel_single_k,
            out_shape=out_shape,
            grid_spec=pltpu.PrefetchScalarGridSpec(
                num_scalar_prefetch=0,
                grid=(grid_i, grid_j),
                in_specs=[
                    pl.BlockSpec((tm, k_pad), lambda i, j: (i, 0)),  # x tile
                    pl.BlockSpec((k_pad, tn), lambda i, j: (0, j)),  # W.T tile
                    pl.BlockSpec((1, tn), lambda i, j: (0, j)),      # bias tile
                ],
                out_specs=pl.BlockSpec((tm, tn), lambda i, j: (i, j)),
            ),
            compiler_params=pltpu.CompilerParams(
                dimension_semantics=("parallel", "parallel"),
                vmem_limit_bytes=vmem_limit,
            ),
        )(x2, w_t, b_pad)
    else:
        out = pl.pallas_call(
            _embedout_kernel_multi_k,
            out_shape=out_shape,
            grid_spec=pltpu.PrefetchScalarGridSpec(
                num_scalar_prefetch=0,
                grid=(grid_i, grid_j, grid_k),
                in_specs=[
                    pl.BlockSpec((tm, tk), lambda i, j, k: (i, k)),  # x tile
                    pl.BlockSpec((tk, tn), lambda i, j, k: (k, j)),  # W.T tile
                    pl.BlockSpec((1, tn), lambda i, j, k: (0, j)),   # bias tile
                ],
                out_specs=pl.BlockSpec((tm, tn), lambda i, j, k: (i, j)),
                scratch_shapes=[pltpu.VMEM((tm, tn), jnp.float32)],
            ),
            compiler_params=pltpu.CompilerParams(
                dimension_semantics=("parallel", "parallel", "arbitrary"),
                vmem_limit_bytes=vmem_limit,
            ),
        )(x2, w_t, b_pad)

    out = out[:m, :vocab]
    return out.reshape(*lead, vocab)


# --------------------------------------------------------------------------
# Demo / correctness check
# --------------------------------------------------------------------------
def _ref_linear(x, weight, bias, stream_dtype):
    # Reference with the same input quantization as the kernel's streaming
    # dtype, accumulated in f32 (what the kernel computes before the final
    # output cast).
    xq = x.astype(stream_dtype).astype(jnp.float32)
    wq = weight.astype(stream_dtype).astype(jnp.float32)
    hidden = x.shape[-1]
    y = xq.reshape(-1, hidden) @ wq.T + bias.astype(jnp.float32)
    return y.reshape(*x.shape[:-1], weight.shape[0])


if __name__ == "__main__":
    key = jax.random.PRNGKey(0)

    # ---- Test 1: shapes consistent with the module (hidden=32, vocab=256,
    #               batch=2, seq=8).  Exercises the single-K-block path. ----
    batch, seq, hidden, vocab = 2, 8, 32, 256
    kx, kw, kb, key = jax.random.split(key, 4)
    bound = 1.0 / (hidden ** 0.5)
    weight = jax.random.uniform(kw, (vocab, hidden), jnp.float32, -bound, bound)
    bias = jax.random.uniform(kb, (vocab,), jnp.float32, -bound, bound)
    x = jax.random.normal(kx, (batch, seq, hidden), jnp.float32)

    w_t, b_pad, plan = prepare_embedout_params(weight, bias)  # one-time prep
    y = embedout(x, w_t, b_pad, plan)                         # bf16 logits
    jax.block_until_ready(y)

    y_ref = _ref_linear(x, weight, bias, plan["stream_dtype"])
    assert y.shape == (batch, seq, vocab)
    err1 = jnp.max(jnp.abs(y.astype(jnp.float32) - y_ref))
    assert float(err1) < 3e-2, float(err1)

    # ---- Test 2: non-128-multiple vocab and multiple K blocks (padding +
    #               accumulator path). ----
    hidden2, vocab2 = 256, 300
    kx2, kw2, kb2, key = jax.random.split(key, 4)
    bound2 = 1.0 / (hidden2 ** 0.5)
    weight2 = jax.random.uniform(kw2, (vocab2, hidden2), jnp.float32, -bound2, bound2)
    bias2 = jax.random.uniform(kb2, (vocab2,), jnp.float32, -bound2, bound2)
    x2_in = jax.random.normal(kx2, (batch, seq, hidden2), jnp.float32)

    w_t2, b_pad2, plan2 = prepare_embedout_params(weight2, bias2, tk=128)
    y2 = embedout(x2_in, w_t2, b_pad2, plan2)
    jax.block_until_ready(y2)

    y2_ref = _ref_linear(x2_in, weight2, bias2, plan2["stream_dtype"])
    assert y2.shape == (batch, seq, vocab2)
    err2 = jnp.max(jnp.abs(y2.astype(jnp.float32) - y2_ref))
    assert float(err2) < 3e-2, float(err2)

    print("KERNEL_OK")
</pallas_src>

<mosaic_0001>
module attributes {stable_mosaic.version = 11 : i64} {
  func.func @_embedout_kernel_single_k(%arg0: i32, %arg1: i32, %arg2: memref<16x128xbf16, #tpu.memory_space<vmem>>, %arg3: memref<128x128xbf16, #tpu.memory_space<vmem>>, %arg4: memref<1x128xf32, #tpu.memory_space<vmem>>, %arg5: memref<16x128xbf16, #tpu.memory_space<vmem>>) attributes {dimension_semantics = [#tpu.dimension_semantics<parallel>, #tpu.dimension_semantics<parallel>], iteration_bounds = array<i64: 1, 2>, scalar_prefetch = 0 : i64, scratch_operands = 0 : i64, tpu.core_type = #tpu.core_type<tc>, window_params = [{transform_indices = @transform_0, window_bounds = array<i64: 16, 128>}, {transform_indices = @transform_1, window_bounds = array<i64: 128, 128>}, {transform_indices = @transform_2, window_bounds = array<i64: 1, 128>}, {transform_indices = @transform_3, window_bounds = array<i64: 16, 128>}]} {
    %c0 = arith.constant 0 : index
    %c0_0 = arith.constant 0 : index
    %0 = vector.load %arg2[%c0, %c0_0] : memref<16x128xbf16, #tpu.memory_space<vmem>>, vector<16x128xbf16>
    %c0_1 = arith.constant 0 : index
    %c0_2 = arith.constant 0 : index
    %1 = vector.load %arg3[%c0_1, %c0_2] : memref<128x128xbf16, #tpu.memory_space<vmem>>, vector<128x128xbf16>
    %cst = arith.constant dense<0.000000e+00> : vector<16x128xf32>
    %2 = tpu.matmul %0, %1, %cst {dimension_numbers = #tpu.dot_dimension_numbers<[1], [0], [0], [1], [0, 0, 1, 1], [], []>} : vector<16x128xbf16>, vector<128x128xbf16>, vector<16x128xf32> -> vector<16x128xf32>
    %c0_3 = arith.constant 0 : index
    %c0_4 = arith.constant 0 : index
    %3 = vector.load %arg4[%c0_3, %c0_4] : memref<1x128xf32, #tpu.memory_space<vmem>>, vector<1x128xf32>
    %4 = vector.broadcast %3 : vector<1x128xf32> to vector<16x128xf32>
    %5 = arith.addf %2, %4 : vector<16x128xf32>
    %6 = arith.truncf %5 : vector<16x128xf32> to vector<16x128xbf16>
    %c0_5 = arith.constant 0 : index
    %c0_6 = arith.constant 0 : index
    %7 = vector.load %arg5[%c0_5, %c0_6] : memref<16x128xbf16, #tpu.memory_space<vmem>>, vector<16x128xbf16>
    tpu.vector_store %arg5[%c0_5, %c0_6], %6 {strides = array<i32>} : memref<16x128xbf16, #tpu.memory_space<vmem>>, vector<16x128xbf16>,
    return
  }
  func.func @transform_0(%arg0: i32, %arg1: i32) -> (i32, i32) {
    %c0_i32 = arith.constant 0 : i32
    %c0_i32_0 = arith.constant 0 : i32
    return %arg0, %c0_i32 : i32, i32
  }
  func.func @transform_1(%arg0: i32, %arg1: i32) -> (i32, i32) {
    %c0_i32 = arith.constant 0 : i32
    %c0_i32_0 = arith.constant 0 : i32
    return %c0_i32, %arg1 : i32, i32
  }
  func.func @transform_2(%arg0: i32, %arg1: i32) -> (i32, i32) {
    %c0_i32 = arith.constant 0 : i32
    %c0_i32_0 = arith.constant 0 : i32
    return %c0_i32, %arg1 : i32, i32
  }
  func.func @transform_3(%arg0: i32, %arg1: i32) -> (i32, i32) {
    %c0_i32 = arith.constant 0 : i32
    return %arg0, %arg1 : i32, i32
  }
}

</mosaic_0001>

<bundles_post_ra>
// kernel: tpu_custom_call.1
= control target key start
LH: loop header
LB: loop body
LE: loop exit
PB: predicated region body
PF: predicated region fallthrough
CT: control target
= control target key end

     0   :  { %8 = vsyncpa [#allocation3], 0  ;;  %s1020_s0 = inlined_call_operand.hbm [shape: bf16[16,128], index: 0, kind: input, shape index: {}]   ;;  %s1021_s1 = inlined_call_operand.hbm [shape: bf16[128,256], index: 1, kind: input, shape index: {}]   ;;  %s1022_s2 = inlined_call_operand.hbm [shape: f32[1,256], index: 2, kind: input, shape index: {}]   ;;  %s1023_s3 = inlined_call_operand.hbm [shape: bf16[16,256], index: 3, kind: output, shape index: {}]  }
   0x1   :  { %9 = vsyncpa [#allocation6], 0 }
   0x2   :  { %11 = vsyncpa [#allocation6 + $0x1], 0 }
   0x3   :  { %12 = vsyncpa [#allocation4], 0 }
   0x4   :  { %14 = vsyncpa [#allocation4 + $0x1], 0  ;;  %s843_s12 = smov 0   ;;  %s845_s13 = smov 0  }
   0x5   :  { %s847_s14 = smov 0   ;;  %s849_s15 = smov 0  }
   0x6   :  { %s851_s16 = smov 0   ;;  %s853_s17 = smov 0  }
   0x7 LB: > { %s29_s18 = sadd.s32 1, %s810_s16  ;;  %s65_s19 = sadd.s32 1, %s802_s14  ;;  %s814_s17 = sphi %s853_s17, %s20_s17   ;;  %s810_s16 = sphi %s851_s16, %s1034_s16   ;;  %s806_s15 = sphi %s849_s15, %s1033_s15   ;;  %s802_s14 = sphi %s847_s14, %s1032_s14   ;;  %s798_s13 = sphi %s845_s13, %s1031_s13   ;;  %s794_s12 = sphi %s843_s12, %s1030_s12  }
   0x8   : > { %p30_p0 = scmp.ge.s32.totalorder %s29_s18, 2  ;;  %p72_p1 = scmp.ne.s32.totalorder %s802_s14, %s798_s13 }
   0x9   : > { %p73_p2 = scmp.eq.s32.totalorder %s814_s17, 0  ;;  %p492_p4 = scmp.ge.s32.totalorder %s814_s17, 2 }
   0xa   : > { %s1036_s18 = smov (%p30_p0, %s29_s18), 0  ;;  %p579_p6 = scmp.lt.s32.totalorder %s814_s17, 2 }
   0xb   : > { %p883_p3 = por %p73_p2, %p72_p1  ;;  %s62_s21 = ssub.s32 %s810_s16, %s1036_s18 }
   0xc   : > { %p63_p5 = scmp.eq.s32.totalorder %s62_s21, 0  ;;  %s173_s22 = sand.u32 1, %s814_s17  }
   0xd   : > { %s175_s23 = sand.u32 1, %s802_s14   ;;  %s494_s26 = sshll.u32 %s810_s16, 2 }
   0xe   : > { %s894_s24 = scalar_select %p63_p5, %s802_s14, %s65_s19  }
   0xf   : > { %s493_s25 = sshll.u32 %s175_s23, 6  ;;  %s181_s29 = scalar_lea.hbm %s1021_s1, %s494_s26 }
  0x10   : > { %s177_s30 = scalar_lea.vmem [#allocation5], %s493_s25  ;;  %s182_s5 = sshll.u32 %s181_s29, 4  ;;  %s183_s5 = int_to_ptr.hbm [resolvable:$true] %s182_s5 }
  0x11   : > { %s184_s4 = sshll.u32 %s177_s30, 4  ;;  %p904_p7 = pnand %p579_p6, %p883_p3  ;;  %s185_s4 = int_to_ptr.vmem [resolvable:$true] %s184_s4 }
  0x12   : > { %s908_s7 = scalar_lea.sflag [#allocation6], %s173_s22  ;;  %s816_s8 = smov 128  }
  0x13   : > { %s817_s9 = smov 64   ;;  %s818_s10 = smov 4  }
  0x14   : > { %570 = dma.hbm_to_vmem [thread:$0]  (!%p904_p7), %s183_s5, 1024, %s185_s4, %s908_s7, %s816_s8, %s817_s9, %s818_s10  }
  0x15   : > { %s916_s11 = sadd.s32 4294967295, %s814_s17   ;;  %s489_s19 = sadd.s32 4294967294, %s814_s17  }
  0x16   : > { %p78_p8 = scmp.ne.s32.totalorder %s798_s13, %s794_s12  ;;  %p79_p9 = scmp.eq.s32.totalorder %s916_s11, 0 }
  0x17   : > { %p130_p10 = scmp.eq.s32.totalorder %s916_s11, 1  ;;  %p136_p11 = scmp.eq.s32.totalorder %s489_s19, 1 }
  0x18   : > { %p925_p12 = por %p79_p9, %p78_p8  ;;  %p490_p13 = scmp.ge.s32.totalorder %s814_s17, 1 }
  0x19   : > { %p933_p0 = por %p130_p10, %p72_p1  ;;  %p937_p2 = por %p136_p11, %p78_p8 }
  0x1a   : > { %p143_p3 = scmp.lt.s32.totalorder %s814_s17, 3  ;;  %s157_s27 = sshll.u32 %s1020_s0, 4  ;;  %s158_s27 = int_to_ptr.hbm [resolvable:$true] %s157_s27 }
  0x1b   : > { %s819_s29 = smov [#allocation2]   ;;  %s200_s8 = scalar_lea.hbm %s1022_s2, %s810_s16 }
  0x1c   : > { %p945_p5 = pnand %p490_p13, %p143_p3  ;;  %s159_s30 = sshll.u32 %s819_s29, 4  ;;  %s160_s30 = int_to_ptr.vmem [resolvable:$true] %s159_s30 }
  0x1d   : > { %s197_s19 = scalar_lea.vmem [#allocation7], %s175_s23  ;;  %s202_s26 = sshll.u32 %s200_s8, 4  ;;  %s203_s26 = int_to_ptr.hbm [resolvable:$true] %s202_s26 }
  0x1e   : > { %p563_p1 = pneg %p945_p5  ;;  %s204_s25 = sshll.u32 %s197_s19, 4  ;;  %s205_s25 = int_to_ptr.vmem [resolvable:$true] %s204_s25 }
  0x1f   : > { %573 = dma.hbm_to_vmem [thread:$0]  (!%p904_p7), %s203_s26, 16, %s205_s25, %s908_s7  }
  0x20   : > { %p564_p6 = pnand %p563_p1, %p79_p9  ;;  %213 = sbr.rel (%p945_p5) target bundleno = 217 (0xd9), region = 32 }
  0x22   : > { %566 = dma.hbm_to_vmem [thread:$0]  (!%p564_p6), %s158_s27, 128, %s160_s30, [#allocation3], %s817_s9, %s817_s9, %s818_s10  }
  0x25   : > { %781 = dma.done.wait (%p79_p9), [#allocation3], 128  }
  0x26   : > { %783 = vsyncadd (%p79_p9), [#allocation3], 4294967168  ;;  %s220_s23 = sand.u32 1, %s916_s11   ;;  %s973_s29 = sand.u32 1, %s798_s13  }
  0x27   : > { %s497_s4 = sshll.u32 %s973_s29, 6  ;;  %s221_s9 = scalar_lea.sflag [#allocation6], %s220_s23 }
  0x28   : > { %s224_s6 = scalar_lea.vmem [#allocation5], %s497_s4 }
  0x29   : > { %785 = dma.done.wait (%p925_p12), %s221_s9, 1040  }
  0x2a   : > { %787 = vsyncadd (%p925_p12), %s221_s9, 4294966256  ;;  %v547_v0 = vld [vmem:[%s224_s6 + $0x38] sm:$0xff]  ;;  %v546_v1 = vld [vmem:[%s224_s6 + $0x30] sm:$0xff]  ;;  %s233_s7 = scalar_lea.vmem [#allocation7], %s973_s29  ;;  %s498_s10 = sshll.u32 %s973_s29, 3 }
  0x2b   : > { %339 = vmatpush.bf16.msra.mxu0 %v547_v0  ;;  %v545_v2 = vld [vmem:[%s224_s6 + $0x28] sm:$0xff]  ;;  %v544_v3 = vld [vmem:[%s224_s6 + $0x20] sm:$0xff]  ;;  %v543_v4 = vld [vmem:[%s224_s6 + $0x18] sm:$0xff]  ;;  %s536_s11 = sshll.u32 %s806_s15, 2  ;;  %s260_s30 = scalar_lea.vmem [#allocation8], %s498_s10 }
  0x2c   : > { %v542_v5 = vld [vmem:[%s224_s6 + $0x10] sm:$0xff]  ;;  %v541_v6 = vld [vmem:[%s224_s6 + $0x8] sm:$0xff]  ;;  %v540_v7 = vld [vmem:[%s224_s6] sm:$0xff]  ;;  %s371_s28 = scalar_lea.hbm %s1023_s3, %s536_s11  ;;  %s372_s5 = sshll.u32 %s260_s30, 4  ;;  %s373_s5 = int_to_ptr.vmem [resolvable:$true] %s372_s5 }
  0x2d   : > { %v539_v8 = vld [vmem:[#allocation2] sm:$0xff]  ;;  %s374_s8 = sshll.u32 %s371_s28, 4  ;;  %s358_s19 = scalar_lea.sflag [#allocation4], %s973_s29  ;;  %s375_s8 = int_to_ptr.hbm [resolvable:$true] %s374_s8 }
  0x2e   : > { %v637_v10 = vld [vmem:[%s233_s7] ss:$0 sm:$0xff]  ;;  %s742_s25 = sshra.s32 %s375_s8, 4  ;;  %s748_s4 = scalar_lea.hbm %s1023_s3, 16  ;;  %s743_s25 = int_to_ptr.hbm [resolvable:$true] %s742_s25 }
  0x2f   : > { %340 = vmatpush.bf16.msra.mxu0 %v546_v1  ;;  %s744_s15 = scalar_lea.hbm %s743_s25, 8  ;;  %p749_p10 = scmp.lt.s32.totalorder %s743_s25, %s1023_s3 }
  0x30   : > { %p745_p7 = scmp.ne.s32.totalorder %s743_s25, %s744_s15  ;;  %p750_p11 = scmp.lt.s32.totalorder %s748_s4, %s744_s15 }
  0x32   : > { %p746_p8 = pnand %p745_p7, %p933_p0  ;;  %p751_p12 = por %p750_p11, %p749_p10 }
  0x33   : > { %341 = vmatpush.bf16.msra.mxu0 %v545_v2 }
  0x34   : > { %p747_p9 = pneg %p746_p8 }
  0x36   : > { %p752_p13 = pnand %p751_p12, %p747_p9 }
  0x37   : > { %342 = vmatpush.bf16.msra.mxu0 %v544_v3 }
  0x3b   : > { %343 = vmatpush.bf16.msra.mxu0 %v543_v4 }
  0x3f   : > { %344 = vmatpush.bf16.msra.mxu0 %v542_v5 }
  0x43   : > { %345 = vmatpush.bf16.msra.mxu0 %v541_v6 }
  0x47   : > { %346 = vmatpush.bf16.msra.mxu0 %v540_v7 }
  0x4a   : > { %347 = vmatmul.bf16.vlgmr.msra.gmra.mxu0 %v539_v8 }
  0xc7   : > { %v348_v9 = vpop.f32.mrf.mxu0 }
  0xc8   : > { %v349_v12 = vadd.f32 %v637_v10, %v348_v9 }
  0xcf   : > { %v350_v11 = vpop.f32.mrf.mxu0 }
  0xd0   : > { %v351_v13 = vadd.f32 %v637_v10, %v350_v11 }
  0xd2   : > { %v551_v14 = vpack.c.bf16 %v351_v13, %v349_v12 }
  0xd4   : > { %552 = vst [vmem:[%s260_s30] sm:$0xff] %v551_v14  }
  0xd5   : > { %755 = shalt.err (!%p752_p13)
}
  0xd6   : > { %s820_s29 = smov 64   ;;  %s821_s7 = smov 128  }
  0xd7   : > { %s822_s10 = smov 4  }
  0xd8   : > { %561 = dma.vmem_to_hbm [thread:$0]  (%p933_p0), %s373_s5, 128, %s375_s8, %s358_s19, %s820_s29, %s821_s7, %s822_s10  }
  0xd9 PF: > { %s389_s11 = sand.u32 1, %s794_s12   ;;  %p575_p3 = pnand %p492_p4, %p937_p2 }
  0xda   : > { %s390_s20 = scalar_lea.sflag [#allocation4], %s389_s11 }
  0xdb   : > { %p576_p5 = pneg %p575_p3 }
  0xdd   : > { %789 = dma.done.wait (%p576_p5), %s390_s20, 128  }
  0xde   : > { %791 = vsyncadd (%p576_p5), %s390_s20, 4294967168  ;;  %s20_s17 = sadd.s32 1, %s814_s17   ;;  %s1030_s12 = smov %s798_s13 }
  0xdf   : > { %p17_p1 = scmp.ge.s32.totalorder %s20_s17, 4   ;;  %s1031_s13 = smov %s802_s14 }
  0xe0   : > { %s1032_s14 = smov %s894_s24  ;;  %s1033_s15 = smov %s810_s16 }
  0xe1   : > { %s1034_s16 = smov %s1036_s18  ;;  %19 = sbr.rel (!%p17_p1) target bundleno = 7 (0x7), region = 94 }
  0xe6   :  { %396 = vsyncpa [#allocation3], 1 }
  0xe7   :  { %398 = vsyncpa [#allocation3 + $0x1], 1 }
  0xe8   :  { %399 = vsyncpa [#allocation6], 1 }
  0xe9   :  { %401 = vsyncpa [#allocation6 + $0x1], 1 }
  0xea   :  { %402 = vsyncpa [#allocation4], 1 }
  0xeb   :  { %404 = vsyncpa [#allocation4 + $0x1], 1 }

</bundles_post_ra>
